<compile_context>
chip_gen: v6e
topology: v6e:2x2x1
jax: 0.10.0
libtpu: 0.0.40
codegen_flags: <defaults>
</compile_context>

<pallas_src>
import math

import jax
import jax.numpy as jnp
from jax.experimental import pallas as pl
from jax.experimental.pallas import tpu as pltpu


N_IN, HID1, HID2, HID3, N_HEADS = 3, 128, 64, 32, 2


def _mlp_kernel(x_ref, w1t_ref, w2t_ref, w3t_ref, wht_ref, bias_ref, out_ref):
    # Feature-major layout: activations are (features, batch); batch on lanes.
    x = x_ref[...]                        # (3, TB)
    w1t = w1t_ref[...]                    # (128, 3)

    b1 = bias_ref[:, 0:1]                 # (128, 1)
    b2 = bias_ref[0:HID2, 1:2]            # (64, 1)
    b3 = bias_ref[0:HID3, 2:3]            # (32, 1)
    bh = bias_ref[0:N_HEADS, 3:4]         # (2, 1)   rows: [b_mu, b_logsigma]

    # Layer 1 (K=3): three broadcast FMAs on the VPU instead of an MXU pass.
    h1 = (w1t[:, 0:1] * x[0:1, :]
          + w1t[:, 1:2] * x[1:2, :]
          + w1t[:, 2:3] * x[2:3, :]
          + b1)
    h1 = jnp.maximum(h1, 0.0)                                              # (128, TB)

    h2 = jnp.dot(w2t_ref[...], h1, preferred_element_type=jnp.float32) + b2
    h2 = jnp.maximum(h2, 0.0)                                              # (64, TB)

    h3 = jnp.dot(w3t_ref[...], h2, preferred_element_type=jnp.float32) + b3
    h3 = jnp.maximum(h3, 0.0)                                              # (32, TB)

    # Merged heads: row 0 = mu, row 1 = logsigma.
    head = jnp.dot(wht_ref[...], h3, preferred_element_type=jnp.float32) + bh  # (2, TB)

    # Apply exp() only to the logsigma row, via a full-block select (exp is on
    # the EUP, a free slot here; the select keeps the store a single dense vst).
    row = jax.lax.broadcasted_iota(jnp.int32, head.shape, 0)
    out_ref[...] = jnp.where(row == 0, head, jnp.exp(head))


def instrument_model_hidden(instrument, params, *, tile_b=256):
    """Run the InstrumentModelHidden forward. Returns (mu, sigma), each (B, 1)."""
    B, D = instrument.shape
    assert D == N_IN, "InstrumentModelHidden expects n_input_dim=3"

    # Lane-dense output requires tile_b to be a multiple of 128.
    tile_b = max(128, (tile_b // 128) * 128)
    Bp = ((B + tile_b - 1) // tile_b) * tile_b

    (w1, b1, w2, b2, w3, b3, wmu, bmu, wls, bls) = params

    # One-time layout plumbing outside the kernel: batch -> lane axis.
    x_t = jnp.pad(instrument.astype(jnp.float32), ((0, Bp - B), (0, 0))).T   # (3, Bp)
    w1t = w1.T                                                               # (128, 3)
    w2t = w2.T                                                               # (64, 128)
    w3t = w3.T                                                               # (32, 64)
    wht = jnp.concatenate([wmu, wls], axis=1).T                              # (2, 32)

    # Pack all biases into a single (128, 4) stream (column j = layer j bias).
    bias_pack = jnp.zeros((HID1, 4), jnp.float32)
    bias_pack = bias_pack.at[:, 0].set(b1.reshape(HID1))
    bias_pack = bias_pack.at[:HID2, 1].set(b2.reshape(HID2))
    bias_pack = bias_pack.at[:HID3, 2].set(b3.reshape(HID3))
    bias_pack = bias_pack.at[0, 3].set(bmu.reshape(()))
    bias_pack = bias_pack.at[1, 3].set(bls.reshape(()))

    grid = (Bp // tile_b,)

    def full_spec(shape):
        return pl.BlockSpec(shape, lambda i: (0, 0))

    out = pl.pallas_call(
        _mlp_kernel,
        out_shape=jax.ShapeDtypeStruct((N_HEADS, Bp), jnp.float32),
        grid_spec=pltpu.PrefetchScalarGridSpec(
            num_scalar_prefetch=0,
            grid=grid,
            in_specs=[
                pl.BlockSpec((N_IN, tile_b), lambda i: (0, i)),   # x (batch on lanes)
                full_spec((HID1, N_IN)),                          # W1^T
                full_spec((HID2, HID1)),                          # W2^T
                full_spec((HID3, HID2)),                          # W3^T
                full_spec((N_HEADS, HID3)),                       # [W_mu | W_logsigma]^T
                full_spec((HID1, 4)),                             # packed biases
            ],
            out_specs=pl.BlockSpec((N_HEADS, tile_b), lambda i: (0, i)),
        ),
        compiler_params=pltpu.CompilerParams(
            dimension_semantics=("parallel",),
        ),
    )(x_t, w1t, w2t, w3t, wht, bias_pack)

    mu = out[0, :B].reshape(B, 1)
    sigma = out[1, :B].reshape(B, 1)
    return mu, sigma


def init_params(key):
    """Deterministic PyTorch-style Linear init: U(-1/sqrt(fan_in), 1/sqrt(fan_in))."""
    def linear(key, fan_in, fan_out):
        kw, kb = jax.random.split(key)
        bound = 1.0 / math.sqrt(fan_in)
        w = jax.random.uniform(kw, (fan_in, fan_out), jnp.float32, -bound, bound)
        b = jax.random.uniform(kb, (1, fan_out), jnp.float32, -bound, bound)
        return w, b

    keys = jax.random.split(key, 5)
    w1, b1 = linear(keys[0], N_IN, HID1)
    w2, b2 = linear(keys[1], HID1, HID2)
    w3, b3 = linear(keys[2], HID2, HID3)
    wmu, bmu = linear(keys[3], HID3, 1)
    wls, bls = linear(keys[4], HID3, 1)
    return (w1, b1, w2, b2, w3, b3, wmu, bmu, wls, bls)


def _reference(instrument, params):
    (w1, b1, w2, b2, w3, b3, wmu, bmu, wls, bls) = params
    h = jnp.maximum(instrument @ w1 + b1, 0.0)
    h = jnp.maximum(h @ w2 + b2, 0.0)
    h = jnp.maximum(h @ w3 + b3, 0.0)
    mu = h @ wmu + bmu
    sigma = jnp.exp(h @ wls + bls)
    return mu, sigma


if __name__ == "__main__":
    key = jax.random.PRNGKey(0)
    k_param, k_data = jax.random.split(key)

    params = init_params(k_param)
    # instrument: (batch=300, n_input_dim=3); 300 is NOT a multiple of tile_b,
    # exercising the padded tail; padded batch 512 -> 2 grid steps (both v7x TCs).
    B = 300
    instrument = jax.random.normal(k_data, (B, N_IN), jnp.float32)

    mu, sigma = instrument_model_hidden(instrument, params, tile_b=256)
    jax.block_until_ready((mu, sigma))

    mu_ref, sigma_ref = _reference(instrument, params)
    assert mu.shape == (B, 1) and sigma.shape == (B, 1)
    assert jnp.allclose(mu, mu_ref, atol=1e-4, rtol=1e-4), \
        float(jnp.max(jnp.abs(mu - mu_ref)))
    assert jnp.allclose(sigma, sigma_ref, atol=1e-4, rtol=1e-4), \
        float(jnp.max(jnp.abs(sigma - sigma_ref)))
    assert bool(jnp.all(sigma > 0.0))

    print("KERNEL_OK")
</pallas_src>

<mosaic_0001>
module attributes {stable_mosaic.version = 11 : i64} {
  func.func @_mlp_kernel(%arg0: i32, %arg1: memref<3x256xf32, #tpu.memory_space<vmem>>, %arg2: memref<128x3xf32, #tpu.memory_space<vmem>>, %arg3: memref<64x128xf32, #tpu.memory_space<vmem>>, %arg4: memref<32x64xf32, #tpu.memory_space<vmem>>, %arg5: memref<2x32xf32, #tpu.memory_space<vmem>>, %arg6: memref<128x4xf32, #tpu.memory_space<vmem>>, %arg7: memref<2x256xf32, #tpu.memory_space<vmem>>) attributes {dimension_semantics = [#tpu.dimension_semantics<parallel>], iteration_bounds = array<i64: 2>, scalar_prefetch = 0 : i64, scratch_operands = 0 : i64, tpu.core_type = #tpu.core_type<tc>, window_params = [{transform_indices = @transform_0, window_bounds = array<i64: 3, 256>}, {pipeline_mode = #tpu.pipeline_mode<synchronous>, transform_indices = @transform_1, window_bounds = array<i64: 128, 3>}, {pipeline_mode = #tpu.pipeline_mode<synchronous>, transform_indices = @transform_2, window_bounds = array<i64: 64, 128>}, {pipeline_mode = #tpu.pipeline_mode<synchronous>, transform_indices = @transform_3, window_bounds = array<i64: 32, 64>}, {pipeline_mode = #tpu.pipeline_mode<synchronous>, transform_indices = @transform_4, window_bounds = array<i64: 2, 32>}, {pipeline_mode = #tpu.pipeline_mode<synchronous>, transform_indices = @transform_5, window_bounds = array<i64: 128, 4>}, {transform_indices = @transform_6, window_bounds = array<i64: 2, 256>}]} {
    %c0 = arith.constant 0 : index
    %c0_0 = arith.constant 0 : index
    %0 = vector.load %arg1[%c0, %c0_0] : memref<3x256xf32, #tpu.memory_space<vmem>>, vector<3x256xf32>
    %c0_1 = arith.constant 0 : index
    %c0_2 = arith.constant 0 : index
    %1 = vector.load %arg2[%c0_1, %c0_2] : memref<128x3xf32, #tpu.memory_space<vmem>>, vector<128x3xf32>
    %c0_3 = arith.constant 0 : index
    %c0_4 = arith.constant 0 : index
    %2 = vector.load %arg6[%c0_3, %c0_4] : memref<128x4xf32, #tpu.memory_space<vmem>>, vector<128x1xf32>
    %c0_5 = arith.constant 0 : index
    %c1 = arith.constant 1 : index
    %3 = vector.load %arg6[%c0_5, %c1] : memref<128x4xf32, #tpu.memory_space<vmem>>, vector<64x1xf32>
    %c0_6 = arith.constant 0 : index
    %c2 = arith.constant 2 : index
    %4 = vector.load %arg6[%c0_6, %c2] : memref<128x4xf32, #tpu.memory_space<vmem>>, vector<32x1xf32>
    %c0_7 = arith.constant 0 : index
    %c3 = arith.constant 3 : index
    %5 = vector.load %arg6[%c0_7, %c3] : memref<128x4xf32, #tpu.memory_space<vmem>>, vector<2x1xf32>
    %6 = vector.extract_strided_slice %1 {offsets = [0, 0], sizes = [128, 1], strides = [1, 1]} : vector<128x3xf32> to vector<128x1xf32>
    %7 = vector.extract_strided_slice %0 {offsets = [0, 0], sizes = [1, 256], strides = [1, 1]} : vector<3x256xf32> to vector<1x256xf32>
    %8 = vector.broadcast %6 : vector<128x1xf32> to vector<128x256xf32>
    %9 = vector.broadcast %7 : vector<1x256xf32> to vector<128x256xf32>
    %10 = arith.mulf %8, %9 : vector<128x256xf32>
    %11 = vector.extract_strided_slice %1 {offsets = [0, 1], sizes = [128, 1], strides = [1, 1]} : vector<128x3xf32> to vector<128x1xf32>
    %12 = vector.extract_strided_slice %0 {offsets = [1, 0], sizes = [1, 256], strides = [1, 1]} : vector<3x256xf32> to vector<1x256xf32>
    %13 = vector.broadcast %11 : vector<128x1xf32> to vector<128x256xf32>
    %14 = vector.broadcast %12 : vector<1x256xf32> to vector<128x256xf32>
    %15 = arith.mulf %13, %14 : vector<128x256xf32>
    %16 = arith.addf %10, %15 : vector<128x256xf32>
    %17 = vector.extract_strided_slice %1 {offsets = [0, 2], sizes = [128, 1], strides = [1, 1]} : vector<128x3xf32> to vector<128x1xf32>
    %18 = vector.extract_strided_slice %0 {offsets = [2, 0], sizes = [1, 256], strides = [1, 1]} : vector<3x256xf32> to vector<1x256xf32>
    %19 = vector.broadcast %17 : vector<128x1xf32> to vector<128x256xf32>
    %20 = vector.broadcast %18 : vector<1x256xf32> to vector<128x256xf32>
    %21 = arith.mulf %19, %20 : vector<128x256xf32>
    %22 = arith.addf %16, %21 : vector<128x256xf32>
    %23 = vector.broadcast %2 : vector<128x1xf32> to vector<128x256xf32>
    %24 = arith.addf %22, %23 : vector<128x256xf32>
    %cst = arith.constant 0.000000e+00 : f32
    %25 = vector.broadcast %cst : f32 to vector<128x256xf32>
    %26 = arith.maximumf %24, %25 : vector<128x256xf32>
    %c0_8 = arith.constant 0 : index
    %c0_9 = arith.constant 0 : index
    %27 = vector.load %arg3[%c0_8, %c0_9] : memref<64x128xf32, #tpu.memory_space<vmem>>, vector<64x128xf32>
    %cst_10 = arith.constant dense<0.000000e+00> : vector<64x256xf32>
    %28 = tpu.matmul %27, %26, %cst_10 {dimension_numbers = #tpu.dot_dimension_numbers<[1], [0], [0], [1], [0, 0, 1, 1], [], []>} : vector<64x128xf32>, vector<128x256xf32>, vector<64x256xf32> -> vector<64x256xf32>
    %29 = vector.broadcast %3 : vector<64x1xf32> to vector<64x256xf32>
    %30 = arith.addf %28, %29 : vector<64x256xf32>
    %cst_11 = arith.constant 0.000000e+00 : f32
    %31 = vector.broadcast %cst_11 : f32 to vector<64x256xf32>
    %32 = arith.maximumf %30, %31 : vector<64x256xf32>
    %c0_12 = arith.constant 0 : index
    %c0_13 = arith.constant 0 : index
    %33 = vector.load %arg4[%c0_12, %c0_13] : memref<32x64xf32, #tpu.memory_space<vmem>>, vector<32x64xf32>
    %cst_14 = arith.constant dense<0.000000e+00> : vector<32x256xf32>
    %34 = tpu.matmul %33, %32, %cst_14 {dimension_numbers = #tpu.dot_dimension_numbers<[1], [0], [0], [1], [0, 0, 1, 1], [], []>} : vector<32x64xf32>, vector<64x256xf32>, vector<32x256xf32> -> vector<32x256xf32>
    %35 = vector.broadcast %4 : vector<32x1xf32> to vector<32x256xf32>
    %36 = arith.addf %34, %35 : vector<32x256xf32>
    %cst_15 = arith.constant 0.000000e+00 : f32
    %37 = vector.broadcast %cst_15 : f32 to vector<32x256xf32>
    %38 = arith.maximumf %36, %37 : vector<32x256xf32>
    %c0_16 = arith.constant 0 : index
    %c0_17 = arith.constant 0 : index
    %39 = vector.load %arg5[%c0_16, %c0_17] : memref<2x32xf32, #tpu.memory_space<vmem>>, vector<2x32xf32>
    %cst_18 = arith.constant dense<0.000000e+00> : vector<2x256xf32>
    %40 = tpu.matmul %39, %38, %cst_18 {dimension_numbers = #tpu.dot_dimension_numbers<[1], [0], [0], [1], [0, 0, 1, 1], [], []>} : vector<2x32xf32>, vector<32x256xf32>, vector<2x256xf32> -> vector<2x256xf32>
    %41 = vector.broadcast %5 : vector<2x1xf32> to vector<2x256xf32>
    %42 = arith.addf %40, %41 : vector<2x256xf32>
    %43 = tpu.iota {dimensions = array<i32: 0>} : vector<2x256xi32>
    %c0_i32 = arith.constant 0 : i32
    %44 = vector.broadcast %c0_i32 : i32 to vector<2x256xi32>
    %45 = arith.cmpi eq, %43, %44 : vector<2x256xi32>
    %46 = math.exp %42 : vector<2x256xf32>
    %47 = arith.select %45, %42, %46 : vector<2x256xi1>, vector<2x256xf32>
    %c0_19 = arith.constant 0 : index
    %c0_20 = arith.constant 0 : index
    %48 = vector.load %arg7[%c0_19, %c0_20] : memref<2x256xf32, #tpu.memory_space<vmem>>, vector<2x256xf32>
    tpu.vector_store %arg7[%c0_19, %c0_20], %47 {strides = array<i32>} : memref<2x256xf32, #tpu.memory_space<vmem>>, vector<2x256xf32>,
    return
  }
  func.func @transform_0(%arg0: i32) -> (i32, i32) {
    %c0_i32 = arith.constant 0 : i32
    %c0_i32_0 = arith.constant 0 : i32
    return %c0_i32, %arg0 : i32, i32
  }
  func.func @transform_1(%arg0: i32) -> (i32, i32) {
    %c0_i32 = arith.constant 0 : i32
    %c0_i32_0 = arith.constant 0 : i32
    %c0_i32_1 = arith.constant 0 : i32
    return %c0_i32, %c0_i32_0 : i32, i32
  }
  func.func @transform_2(%arg0: i32) -> (i32, i32) {
    %c0_i32 = arith.constant 0 : i32
    %c0_i32_0 = arith.constant 0 : i32
    %c0_i32_1 = arith.constant 0 : i32
    return %c0_i32, %c0_i32_0 : i32, i32
  }
  func.func @transform_3(%arg0: i32) -> (i32, i32) {
    %c0_i32 = arith.constant 0 : i32
    %c0_i32_0 = arith.constant 0 : i32
    %c0_i32_1 = arith.constant 0 : i32
    return %c0_i32, %c0_i32_0 : i32, i32
  }
  func.func @transform_4(%arg0: i32) -> (i32, i32) {
    %c0_i32 = arith.constant 0 : i32
    %c0_i32_0 = arith.constant 0 : i32
    %c0_i32_1 = arith.constant 0 : i32
    return %c0_i32, %c0_i32_0 : i32, i32
  }
  func.func @transform_5(%arg0: i32) -> (i32, i32) {
    %c0_i32 = arith.constant 0 : i32
    %c0_i32_0 = arith.constant 0 : i32
    %c0_i32_1 = arith.constant 0 : i32
    return %c0_i32, %c0_i32_0 : i32, i32
  }
  func.func @transform_6(%arg0: i32) -> (i32, i32) {
    %c0_i32 = arith.constant 0 : i32
    %c0_i32_0 = arith.constant 0 : i32
    return %c0_i32, %arg0 : i32, i32
  }
}

</mosaic_0001>

<bundles_post_ra>
// kernel: tpu_custom_call.1
= control target key start
LH: loop header
LB: loop body
LE: loop exit
PB: predicated region body
PF: predicated region fallthrough
CT: control target
= control target key end

     0   :  { %11 = vsyncpa [#allocation3], 0  ;;  %s2073_s0 = inlined_call_operand.vmem [shape: f32[3,512], index: 0, kind: input, shape index: {}]   ;;  %s2074_s1 = inlined_call_operand.vmem [shape: f32[128,3], index: 1, kind: input, shape index: {}]   ;;  %s2075_s2 = inlined_call_operand.vmem [shape: f32[64,128], index: 2, kind: input, shape index: {}]   ;;  %s2076_s3 = inlined_call_operand.vmem [shape: f32[32,64], index: 3, kind: input, shape index: {}]   ;;  %s2077_s4 = inlined_call_operand.vmem [shape: f32[2,32], index: 4, kind: input, shape index: {}]   ;;  %s2078_s5 = inlined_call_operand.vmem [shape: f32[128,4], index: 5, kind: input, shape index: {}]   ;;  %s2079_s6 = inlined_call_operand.hbm [shape: f32[2,512], index: 6, kind: output, shape index: {}]  }
   0x1   :  { %13 = vsyncpa [#allocation3 + $0x1], 0  ;;  %s1545_s21 = smov 0   ;;  %s1547_s22 = smov 0  }
   0x2   :  { %s1549_s23 = smov 0   ;;  %s1551_s24 = smov 0  }
   0x3 LB: > { %s1566_s25 = sadd.s32 4294967295, %s1502_s24   ;;  %s1329_s26 = sadd.s32 4294967294, %s1502_s24   ;;  %s1502_s24 = sphi %s1551_s24, %s2085_s24   ;;  %s1498_s23 = sphi %s1549_s23, %s2084_s23   ;;  %s1494_s22 = sphi %s1547_s22, %s2083_s22   ;;  %s1490_s21 = sphi %s1545_s21, %s2082_s21  }
   0x4   : > { %s1570_s27 = sadd.s32 1, %s1502_s24   ;;  %s157_s28 = sadd.s32 1, %s1498_s23 }
   0x5   : > { %s154_s29 = ssub.s32 %s1502_s24, %s1570_s27  ;;  %p167_p0 = scmp.ne.s32.totalorder %s1498_s23, %s1494_s22 }
   0x6   : > { %p155_p1 = scmp.eq.s32.totalorder %s154_s29, 0  ;;  %p168_p2 = scmp.eq.s32.totalorder %s1566_s25, 1 }
   0x7   : > { %p173_p3 = scmp.ne.s32.totalorder %s1494_s22, %s1490_s21  ;;  %p174_p4 = scmp.eq.s32.totalorder %s1329_s26, 1 }
   0x8   : > { %s1581_s30 = scalar_select %p155_p1, %s1498_s23, %s157_s28  }
   0x9   : > { %p1583_p5 = por %p168_p2, %p167_p0  ;;  %p1587_p6 = por %p174_p4, %p173_p3 }
   0xa   : > { %p1332_p7 = scmp.ge.s32.totalorder %s1502_s24, 1  ;;  %p216_p8 = scmp.lt.s32.totalorder %s1502_s24, 3 }
   0xc   : > { %p217_p9 = pnand %p1332_p7, %p216_p8 }
   0xd   : > { %s1334_s11 = sshll.u32 (!%p217_p9), %s1566_s25, 1  ;;  %s243_s16 = sand.u32 (!%p217_p9), 1, %s1494_s22  }
   0xe   : > { %220 = sbr.rel (%p217_p9) target bundleno = 1032 (0x408), region = 44  ;;  %p247_p10 = scmp.lt.s32.totalorder (!%p217_p9), %s1334_s11, 3 }
   0xf   : > { %s1333_s17 = sshll.u32 (!%p217_p9), %s243_s16, 2  ;;  %s1347_s18 = sshll.u32 (!%p217_p9), %s1566_s25, 6 }
  0x10   : > { %s245_s19 = scalar_lea.vmem (!%p217_p9), [#allocation2], %s1333_s17  ;;  %s1268_s29 = scalar_lea.hbm (!%p217_p9), %s2079_s6, %s1347_s18 }
  0x11   : > { %s1270_s20 = sshll.u32 (!%p217_p9), %s245_s19, 4  ;;  %s1256_s9 = scalar_lea.sflag (!%p217_p9), [#allocation3], %s243_s16  ;;  %s1271_s20 = int_to_ptr.vmem [resolvable:$true] %s1270_s20 }
  0x12   : > { %s1442_s10 = scalar_lea.vmem (!%p217_p9), %s1271_s20, 64 }
  0x13   : > { %v268_v0 = vld [vmem:[%s2074_s1 + $0x70] sm:$0xff]  ;;  %v267_v1 = vld [vmem:[%s2074_s1 + $0x68] sm:$0xff]  ;;  %v1504_v2 = vmov 2   ;;  %v1505_v3 = vmov 0   ;;  %v269_v4 = vld [vmem:[%s2074_s1 + $0x78] sm:$0xff]  ;;  %v1506_v5 = vmov 1   ;;  %v368_v42 = vlaneseq  ;;  %p1443_p11 = scmp.ne.s32.totalorder %s1271_s20, %s1442_s10 }
  0x14   : > { %1398 = vset.pattern.permute.xlu0 %v1504_v2  ;;  %1392 = vset.pattern.permute.xlu1 %v1505_v3  ;;  %v265_v6 = vld [vmem:[%s2074_s1 + $0x58] sm:$0xff]  ;;  %v263_v7 = vld [vmem:[%s2074_s1 + $0x48] sm:$0xff]  ;;  %v266_v10 = vld [vmem:[%s2074_s1 + $0x60] sm:$0xff]  ;;  %s2087_s11 = smov (!%p247_p10, %s1334_s11), 3  ;;  %vm1043_vm0 = vcmask 523264   ;;  %vm1159_vm1 = vcmask 261120  }
  0x15   : > { %359 = vperm.xlu1 %1392, %v268_v0   ;;  %617 = vperm.xlu0 %1398, %v267_v1   ;;  %v1617_v8 = vld [vmem:[%s2074_s1 + $0x38] sm:$0xff]  ;;  %v1623_v9 = vld [vmem:[%s2074_s1 + $0x28] sm:$0xff]  ;;  %v284_v14 = vld [vmem:[%s2078_s5 + $0x70] sm:$0xff]  ;;  %s1335_s12 = sshll.u32 %s2087_s11, 2  ;;  %v1776_v44 = vshrl.u32 %v368_v42, 7  ;;  %p1444_p12 = pnand %p1443_p11, %p1583_p5 }
  0x16   : > { %v1633_v11 = vld [vmem:[%s2074_s1 + $0x18] sm:$0xff]  ;;  %v1640_v12 = vld [vmem:[%s2074_s1 + $0x8] sm:$0xff]  ;;  %v264_v15 = vld [vmem:[%s2074_s1 + $0x50] sm:$0xff]  ;;  %s250_s15 = scalar_lea.vmem %s2073_s0, %s1335_s12  ;;  %s1509_s11 = smov [#allocation2]  }
  0x17   : > { %v285_v13 = vld [vmem:[%s2078_s5 + $0x78] sm:$0xff]  ;;  %v283_v16 = vld [vmem:[%s2078_s5 + $0x68] sm:$0xff]  ;;  %v262_v17 = vld [vmem:[%s2074_s1 + $0x40] sm:$0xff]  ;;  %v484_v47 = vsub.s32 1, %v1776_v44  ;;  %v488_v48 = vsub.s32 5, %v1776_v44  ;;  %v370_v49 = vsub.s32 0, %v1776_v44  ;;  %p1445_p13 = pneg %p1444_p12 }
  0x18   : > { %v281_v18 = vld [vmem:[%s2078_s5 + $0x58] sm:$0xff]  ;;  %v260_v19 = vld [vmem:[%s2074_s1 + $0x30] sm:$0xff]  ;;  %v279_v20 = vld [vmem:[%s2078_s5 + $0x48] sm:$0xff]  ;;  %v374_v50 = vsub.s32 4, %v1776_v44  ;;  %v630_v52 = vsub.s32 2, %v1776_v44  ;;  %v634_v53 = vsub.s32 6, %v1776_v44 }
  0x19   : > { %1393 = vset.pattern.permute.xlu1 %v1506_v5  ;;  %1399 = vset.pattern.permute.xlu0 %v1506_v5  ;;  %v282_v21 = vld [vmem:[%s2078_s5 + $0x60] sm:$0xff]  ;;  %v1688_v23 = vld [vmem:[%s2078_s5 + $0x38] sm:$0xff]  ;;  %v1695_v24 = vld [vmem:[%s2074_s1 + $0x10] sm:$0xff]  ;;  %vm1236_vm2 = vcmp.eq.s32.totalorder %v1776_v44, 0  ;;  %s1446_s25 = sshll.u32 %s1509_s11, 4  ;;  %s1447_s25 = int_to_ptr.vmem [resolvable:$false] %s1446_s25 }
  0x1a   : > { %475 = vperm.xlu1 %1393, %v268_v0   ;;  %479 = vperm.xlu0 %1399, %v269_v4   ;;  %v1681_v22 = vld [vmem:[%s2074_s1 + $0x20] sm:$0xff]  ;;  %v1702_v25 = vld [vmem:[%s2078_s5 + $0x28] sm:$0xff]  ;;  %v273_v27 = vld [vmem:[%s2078_s5 + $0x18] sm:$0xff]  ;;  %s1448_s12 = scalar_lea.vmem %s1447_s25, 128  ;;  %p1449_p0 = scmp.lt.s32.totalorder %s1271_s20, %s1447_s25 }
  0x1b   : > { %v1709_v26 = vld [vmem:[%s2074_s1] sm:$0xff]  ;;  %v280_v28 = vld [vmem:[%s2078_s5 + $0x50] sm:$0xff]  ;;  %v1745_v32 = vld [vmem:[%s2078_s5 + $0x8] sm:$0xff]  ;;  %p1450_p1 = scmp.lt.s32.totalorder %s1448_s12, %s1442_s10 }
  0x1c   : > { %v1723_v29 = vld [vmem:[%s2078_s5 + $0x10] sm:$0xff]  ;;  %v1730_v30 = vld [vmem:[%s2078_s5] sm:$0xff] }
  0x1d   : > { %v276_v31 = vld [vmem:[%s2078_s5 + $0x30] sm:$0xff]  ;;  %v278_v33 = vld [vmem:[%s2078_s5 + $0x40] sm:$0xff]  ;;  %p1451_p2 = por %p1450_p1, %p1449_p0 }
  0x1e   : > { %1394 = vset.pattern.permute.xlu1 %v1504_v2  ;;  %463 = vperm.xlu0 %1399, %v265_v6   ;;  %v253_v51 = vld [vmem:[%s250_s15] sm:$0x77] }
  0x1f   : > { %625 = vperm.xlu1 %1394, %v269_v4   ;;  %v485_v56 = vrot.slane %v253_v51, %v484_v47  ;;  %v489_v57 = vrot.slane %v253_v51, %v488_v48  ;;  %v371_v58 = vrot.slane %v253_v51, %v370_v49  ;;  %v375_v59 = vrot.slane %v253_v51, %v374_v50  ;;  %p1452_p3 = pnand %p1451_p2, %p1445_p13 }
  0x20   : > { %v631_v60 = vrot.slane %v253_v51, %v630_v52  ;;  %v635_v61 = vrot.slane %v253_v51, %v634_v53 }
  0x22   : > { %455 = vperm.xlu0 %1399, %v263_v7  }
  0x23   : > { %1395 = vset.pattern.permute.xlu1 %v1506_v5 }
  0x24   : > { %471 = vperm.xlu1 %1395, %v267_v1  }
  0x26   : > { %447 = vperm.xlu0 %1399, %v1617_v8  }
  0x28   : > { %1396 = vset.pattern.permute.xlu1 %v1504_v2 }
  0x29   : > { %621 = vperm.xlu1 %1396, %v268_v0   ;;  %v1799_v0 = vrot.slane %v485_v56, %v484_v47 }
  0x2a   : > { %439 = vperm.xlu0 %1399, %v1623_v9  }
  0x2d   : > { %1397 = vset.pattern.permute.xlu1 %v1506_v5 }
  0x2e   : > { %467 = vperm.xlu1 %1397, %v266_v10   ;;  %431 = vperm.xlu0 %1399, %v1633_v11  }
  0x32   : > { %1400 = vset.pattern.permute.xlu1 %v1505_v3  ;;  %423 = vperm.xlu0 %1399, %v1640_v12  }
  0x33   : > { %787 = vperm.xlu1 %1400, %v285_v13  }
  0x36   : > { %1426 = vset.pattern.permute.xlu0 %v1505_v3 }
  0x37   : > { %344 = vperm.xlu1 %1400, %v265_v6   ;;  %364 = vperm.xlu0 %1426, %v269_v4   ;;  %v1804_v4 = vrot.slane %v371_v58, %v370_v49  ;;  %v1843_v58 = vld [vmem:[%s2078_s5 + $0x20] sm:$0xff] }
  0x3b   : > { %1401 = vset.pattern.permute.xlu1 %v1504_v2  ;;  %354 = vperm.xlu0 %1426, %v267_v1   ;;  %v1801_v1 = vrot.slane %v489_v57, %v484_v47 }
  0x3c   : > { %613 = vperm.xlu1 %1401, %v266_v10  }
  0x3f   : > { %349 = vperm.xlu0 %1426, %v266_v10  }
  0x40   : > { %1402 = vset.pattern.permute.xlu1 %v1505_v3 }
  0x41   : > { %782 = vperm.xlu1 %1402, %v284_v14  }
  0x43   : > { %339 = vperm.xlu0 %1426, %v264_v15  }
  0x45   : > { %1403 = vset.pattern.permute.xlu1 %v1506_v5 }
  0x46   : > { %459 = vperm.xlu1 %1403, %v264_v15  }
  0x47   : > { %777 = vperm.xlu0 %1426, %v283_v16  }
  0x4a   : > { %1404 = vset.pattern.permute.xlu1 %v1504_v2 }
  0x4b   : > { %609 = vperm.xlu1 %1404, %v265_v6   ;;  %329 = vperm.xlu0 %1426, %v262_v17   ;;  %v1806_v6 = vrot.slane %v375_v59, %v370_v49 }
  0x4f   : > { %1405 = vset.pattern.permute.xlu1 %v1505_v3  ;;  %767 = vperm.xlu0 %1426, %v281_v18  }
  0x50   : > { %334 = vperm.xlu1 %1405, %v263_v7  }
  0x53   : > { %319 = vperm.xlu0 %1426, %v260_v19  }
  0x54   : > { %1406 = vset.pattern.permute.xlu1 %v1504_v2 }
  0x55   : > { %605 = vperm.xlu1 %1406, %v264_v15  }
  0x57   : > { %757 = vperm.xlu0 %1426, %v279_v20  }
  0x59   : > { %1407 = vset.pattern.permute.xlu1 %v1505_v3 }
  0x5a   : > { %772 = vperm.xlu1 %1407, %v282_v21  }
  0x5b   : > { %309 = vperm.xlu0 %1426, %v1681_v22  }
  0x5e   : > { %1408 = vset.pattern.permute.xlu1 %v1506_v5 }
  0x5f   : > { %451 = vperm.xlu1 %1408, %v262_v17   ;;  %747 = vperm.xlu0 %1426, %v1688_v23  }
  0x63   : > { %1409 = vset.pattern.permute.xlu1 %v1504_v2  ;;  %299 = vperm.xlu0 %1426, %v1695_v24  }
  0x64   : > { %601 = vperm.xlu1 %1409, %v263_v7   ;;  %v1808_v7 = vrot.slane %v631_v60, %v630_v52 }
  0x67   : > { %737 = vperm.xlu0 %1426, %v1702_v25  }
  0x68   : > { %1410 = vset.pattern.permute.xlu1 %v1505_v3 }
  0x69   : > { %324 = vperm.xlu1 %1410, %v1617_v8  }
  0x6b   : > { %289 = vperm.xlu0 %1426, %v1709_v26  }
  0x6d   : > { %1411 = vset.pattern.permute.xlu1 %v1504_v2 }
  0x6e   : > { %597 = vperm.xlu1 %1411, %v262_v17  }
  0x6f   : > { %727 = vperm.xlu0 %1426, %v273_v27  }
  0x72   : > { %1412 = vset.pattern.permute.xlu1 %v1505_v3 }
  0x73   : > { %762 = vperm.xlu1 %1412, %v280_v28   ;;  %722 = vperm.xlu0 %1426, %v1723_v29  }
  0x77   : > { %1413 = vset.pattern.permute.xlu1 %v1506_v5  ;;  %712 = vperm.xlu0 %1426, %v1730_v30  }
  0x78   : > { %443 = vperm.xlu1 %1413, %v260_v19  }
  0x7b   : > { %1433 = vset.pattern.permute.xlu0 %v1506_v5 }
  0x7c   : > { %1414 = vset.pattern.permute.xlu1 %v1504_v2  ;;  %887 = vperm.xlu0 %1433, %v276_v31  }
  0x7d   : > { %593 = vperm.xlu1 %1414, %v1617_v8   ;;  %v1810_v8 = vrot.slane %v635_v61, %v630_v52 }
  0x80   : > { %875 = vperm.xlu0 %1433, %v273_v27  }
  0x81   : > { %1415 = vset.pattern.permute.xlu1 %v1505_v3 }
  0x82   : > { %314 = vperm.xlu1 %1415, %v1623_v9  }
  0x84   : > { %867 = vperm.xlu0 %1433, %v1745_v32  }
  0x86   : > { %1416 = vset.pattern.permute.xlu1 %v1504_v2 }
  0x87   : > { %589 = vperm.xlu1 %1416, %v260_v19  }
  0x88   : > { %1434 = vset.pattern.permute.xlu0 %v1504_v2 }
  0x89   : > { %1040 = vperm.xlu0 %1434, %v273_v27  }
  0x8b   : > { %1417 = vset.pattern.permute.xlu1 %v1505_v3 }
  0x8c   : > { %752 = vperm.xlu1 %1417, %v278_v33  }
  0x8d   : > { %1028 = vperm.xlu0 %1434, %v1730_v30  }
  0x90   : > { %v1755_v34 = vpop.permute.xlu1 %359  ;;  %1418 = vset.pattern.permute.xlu1 %v1506_v5  ;;  %v1758_v35 = vpop.permute.xlu0 %617 }
  0x91   : > { %435 = vperm.xlu1 %1418, %v1681_v22   ;;  %v415_v27 = vmul.f32 %v1806_v6, %v1755_v34  ;;  %v673_v60 = vmul.f32 %v1810_v8, %v1758_v35 }
  0x95   : > { %v476_v36 = vpop.permute.xlu1 %475  ;;  %1419 = vset.pattern.permute.xlu1 %v1504_v2  ;;  %v480_v37 = vpop.permute.xlu0 %479 }
  0x96   : > { %585 = vperm.xlu1 %1419, %v1623_v9   ;;  %v530_v9 = vmul.f32 %v1799_v0, %v480_v37  ;;  %v531_v10 = vmul.f32 %v1801_v1, %v480_v37  ;;  %v529_v17 = vmul.f32 %v1801_v1, %v476_v36 }
  0x98   : > { %v561_v48 = vadd.f32 %v529_v17, %v415_v27 }
  0x99   : > { %v1764_v38 = vpop.permute.xlu0 %463 }
  0x9a   : > { %v626_v39 = vpop.permute.xlu1 %625  ;;  %1420 = vset.pattern.permute.xlu1 %v1505_v3 }
  0x9b   : > { %304 = vperm.xlu1 %1420, %v1633_v11   ;;  %v676_v18 = vmul.f32 %v1808_v7, %v626_v39  ;;  %v677_v19 = vmul.f32 %v1810_v8, %v626_v39 }
  0x9d   : > { %v1768_v40 = vpop.permute.xlu0 %455 }
  0x9f   : > { %v1770_v41 = vpop.permute.xlu1 %471  ;;  %1421 = vset.pattern.permute.xlu1 %v1504_v2 }
  0xa0   : > { %581 = vperm.xlu1 %1421, %v1681_v22   ;;  %v414_v22 = vmul.f32 %v1804_v4, %v1755_v34  ;;  %v526_v51 = vmul.f32 %v1799_v0, %v1770_v41 }
  0xa1   : > { %v1774_v43 = vpop.permute.xlu0 %447 }
  0xa4   : > { %v622_v45 = vpop.permute.xlu1 %621  ;;  %1422 = vset.pattern.permute.xlu1 %v1505_v3 }
  0xa5   : > { %742 = vperm.xlu1 %1422, %v276_v31   ;;  %v1779_v46 = vpop.permute.xlu0 %439  ;;  %v674_v31 = vmul.f32 %v1808_v7, %v622_v45  ;;  %v675_v33 = vmul.f32 %v1810_v8, %v622_v45  ;;  %v527_v45 = vmul.f32 %v1801_v1, %v1770_v41 }
  0xa7   : > { %v707_v56 = vadd.f32 %v675_v33, %v561_v48 }
  0xa9   : > { %v1790_v54 = vpop.permute.xlu1 %467  ;;  %1423 = vset.pattern.permute.xlu1 %v1506_v5  ;;  %v1793_v55 = vpop.permute.xlu0 %431 }
  0xaa   : > { %427 = vperm.xlu1 %1423, %v1695_v24  }
  0xad   : > { %v1796_v62 = vpop.permute.xlu0 %423 }
  0xae   : > { %v788_v63 = vpop.permute.xlu1 %787  ;;  %1424 = vset.pattern.permute.xlu1 %v1504_v2 }
  0xaf   : > { %577 = vperm.xlu1 %1424, %v1633_v11   ;;  %v528_v11 = vmul.f32 %v1799_v0, %v476_v36 }
  0xb1   : > { %v560_v47 = vadd.f32 %v528_v11, %v414_v22 }
  0xb2   : > { %v1814_v13 = vpop.permute.xlu1 %344  ;;  %v365_v14 = vpop.permute.xlu0 %364 }
  0xb3   : > { %v416_v15 = vmul.f32 %v1804_v4, %v365_v14  ;;  %v417_v16 = vmul.f32 %v1806_v6, %v365_v14  ;;  %1425 = vset.pattern.permute.xlu1 %v1505_v3  ;;  %v706_v53 = vadd.f32 %v674_v31, %v560_v47  ;;  %v523_v31 = vmul.f32 %v1801_v1, %v1764_v38 }
  0xb4   : > { %294 = vperm.xlu1 %1425, %v1640_v12   ;;  %v409_v33 = vmul.f32 %v1806_v6, %v1814_v13  ;;  %v522_v47 = vmul.f32 %v1799_v0, %v1764_v38 }
  0xb5   : > { %v562_v20 = vadd.f32 %v530_v9, %v416_v15  ;;  %v563_v21 = vadd.f32 %v531_v10, %v417_v16 }
  0xb6   : > { %v355_v28 = vpop.permute.xlu0 %354 }
  0xb7   : > { %v1830_v36 = vpop.permute.xlu1 %613  ;;  %v709_v37 = vadd.f32 %v677_v19, %v563_v21  ;;  %v708_v42 = vadd.f32 %v676_v18, %v562_v20  ;;  %v412_v39 = vmul.f32 %v1804_v4, %v355_v28  ;;  %v413_v49 = vmul.f32 %v1806_v6, %v355_v28 }
  0xb8   : > { %1427 = vset.pattern.permute.xlu1 %v1504_v2 }
  0xb9   : > { %573 = vperm.xlu1 %1427, %v1695_v24   ;;  %v821_v34 = vadd.f32 %v788_v63, %v709_v37  ;;  %v820_v50 = vadd.f32 %v788_v63, %v708_v42  ;;  %v672_v24 = vmul.f32 %v1808_v7, %v1758_v35  ;;  %v558_v63 = vadd.f32 %v526_v51, %v412_v39 }
  0xba   : > { %v350_v52 = vpop.permute.xlu0 %349  ;;  %v559_v9 = vadd.f32 %v527_v45, %v413_v49  ;;  %v524_v39 = vmul.f32 %v1799_v0, %v1790_v54  ;;  %v525_v49 = vmul.f32 %v1801_v1, %v1790_v54  ;;  %v555_v51 = vadd.f32 %v523_v31, %v409_v33 }
  0xbb   : > { %v853_v57 = vmax.f32 %v821_v34, 0.0  ;;  %v852_v59 = vmax.f32 %v820_v50, 0.0  ;;  %v704_v17 = vadd.f32 %v672_v24, %v558_v63  ;;  %v410_v37 = vmul.f32 %v1804_v4, %v350_v52 }
  0xbc   : > { %v783_v61 = vpop.permute.xlu1 %782  ;;  %v705_v35 = vadd.f32 %v673_v60, %v559_v9  ;;  %v411_v42 = vmul.f32 %v1806_v6, %v350_v52 }
  0xbd   : > { %v818_v41 = vadd.f32 %v783_v61, %v706_v53  ;;  %v819_v10 = vadd.f32 %v783_v61, %v707_v56  ;;  %1428 = vset.pattern.permute.xlu1 %v1505_v3  ;;  %894 = vmatprep.subr.mxu0 %v853_v57  ;;  %v671_v53 = vmul.f32 %v1810_v8, %v1830_v36  ;;  %v1507_v61 = vmov 0.0  }
  0xbe   : > { %v1850_v14 = vpop.permute.xlu0 %339  ;;  %732 = vperm.xlu1 %1428, %v1843_v58   ;;  %895 = vmatpush1.msra.mxu0 %v852_v59  ;;  %v557_v45 = vadd.f32 %v525_v49, %v411_v42 }
  0xbf   : > { %v850_v15 = vmax.f32 %v818_v41, 0.0  ;;  %v851_v16 = vmax.f32 %v819_v10, 0.0  ;;  %958 = vmatprep.mubr.f32.mxu0 %v1507_v61  ;;  %1120 = vmatprep.mubr.f32.mxu1 %v1507_v61 }
  0xc0   : > { %v703_v24 = vadd.f32 %v671_v53, %v557_v45 }
  0xc1   : > { %v1853_v11 = vpop.permute.xlu1 %459  ;;  %896 = vmatprep.subr.mxu0 %v851_v16 }
  0xc2   : > { %v778_v18 = vpop.permute.xlu0 %777  ;;  %1429 = vset.pattern.permute.xlu1 %v1506_v5  ;;  %897 = vmatpush1.msra.mxu0 %v850_v15 }
  0xc3   : > { %v816_v19 = vadd.f32 %v778_v18, %v704_v17  ;;  %v817_v20 = vadd.f32 %v778_v18, %v705_v35  ;;  %419 = vperm.xlu1 %1429, %v1709_v26   ;;  %v519_v35 = vmul.f32 %v1801_v1, %v1768_v40 }
  0xc5   : > { %v848_v21 = vmax.f32 %v816_v19, 0.0  ;;  %v849_v22 = vmax.f32 %v817_v20, 0.0  ;;  %v518_v19 = vmul.f32 %v1799_v0, %v1768_v40 }
  0xc6   : > { %v610_v27 = vpop.permute.xlu1 %609  ;;  %v1870_v48 = vpop.permute.xlu0 %329 }
  0xc7   : > { %1430 = vset.pattern.permute.xlu1 %v1504_v2  ;;  %898 = vmatprep.subr.mxu0 %v849_v22  ;;  %v669_v34 = vmul.f32 %v1810_v8, %v610_v27  ;;  %v668_v50 = vmul.f32 %v1808_v7, %v610_v27  ;;  %v520_v22 = vmul.f32 %v1799_v0, %v1853_v11 }
  0xc8   : > { %569 = vperm.xlu1 %1430, %v1640_v12   ;;  %899 = vmatpush1.msra.mxu0 %v848_v21  ;;  %v408_v12 = vmul.f32 %v1804_v4, %v1814_v13  ;;  %v670_v13 = vmul.f32 %v1808_v7, %v1830_v36  ;;  %v521_v27 = vmul.f32 %v1801_v1, %v1853_v11 }
  0xc9   : > { %v701_v54 = vadd.f32 %v669_v34, %v555_v51 }
  0xca   : > { %v554_v38 = vadd.f32 %v522_v47, %v408_v12  ;;  %v768_v56 = vpop.permute.xlu0 %767 }
  0xcb   : > { %v335_v28 = vpop.permute.xlu1 %334 }
  0xcc   : > { %565 = vperm.xlu1 %1430, %v1709_v26   ;;  %v556_v26 = vadd.f32 %v524_v39, %v410_v37  ;;  %v700_v57 = vadd.f32 %v668_v50, %v554_v38  ;;  %v405_v18 = vmul.f32 %v1806_v6, %v335_v28  ;;  %v404_v20 = vmul.f32 %v1804_v4, %v335_v28 }
  0xce   : > { %v702_v59 = vadd.f32 %v670_v13, %v556_v26  ;;  %v812_v41 = vadd.f32 %v768_v56, %v700_v57  ;;  %v1899_v21 = vpop.permute.xlu0 %319  ;;  %v551_v33 = vadd.f32 %v519_v35, %v405_v18  ;;  %v515_v57 = vmul.f32 %v1801_v1, %v1774_v43 }
  0xd0   : > { %v606_v52 = vpop.permute.xlu1 %605  ;;  %1431 = vset.pattern.permute.xlu1 %v1505_v3  ;;  %v813_v3 = vadd.f32 %v768_v56, %v701_v54  ;;  %v844_v17 = vmax.f32 %v812_v41, 0.0 }
  0xd1   : > { %717 = vperm.xlu1 %1431, %v1745_v32   ;;  %v666_v28 = vmul.f32 %v1808_v7, %v606_v52  ;;  %v667_v37 = vmul.f32 %v1810_v8, %v606_v52 }
  0xd2   : > { %v845_v15 = vmax.f32 %v813_v3, 0.0  ;;  %v758_v39 = vpop.permute.xlu0 %757  ;;  %v403_v3 = vmul.f32 %v1806_v6, %v1870_v48 }
  0xd5   : > { %v773_v60 = vpop.permute.xlu1 %772  ;;  %1432 = vset.pattern.permute.xlu1 %v1506_v5 }
  0xd6   : > { %v814_v63 = vadd.f32 %v773_v60, %v702_v59  ;;  %v815_v9 = vadd.f32 %v773_v60, %v703_v24  ;;  %891 = vperm.xlu1 %1432, %v1688_v23   ;;  %v402_v24 = vmul.f32 %v1804_v4, %v1870_v48 }
  0xd8   : > { %v846_v36 = vmax.f32 %v814_v63, 0.0  ;;  %v847_v10 = vmax.f32 %v815_v9, 0.0 }
  0xda   : > { %v452_v16 = vpop.permute.xlu1 %451  ;;  %900 = vmatprep.subr.mxu0 %v847_v10  ;;  %883 = vperm.xlu1 %1432, %v1702_v25   ;;  %v406_v25 = vmul.f32 %v1804_v4, %v1850_v14 }
  0xdb   : > { %901 = vmatpush1.msra.mxu0 %v846_v36  ;;  %v516_v63 = vmul.f32 %v1799_v0, %v452_v16  ;;  %v517_v9 = vmul.f32 %v1801_v1, %v452_v16  ;;  %v1928_v36 = vpop.permute.xlu0 %309 }
  0xdc   : > { %902 = vmatprep.subr.mxu0 %v845_v15 }
  0xdd   : > { %903 = vmatpush1.msra.mxu0 %v844_v17  ;;  %v548_v35 = vadd.f32 %v516_v63, %v402_v24  ;;  %v549_v18 = vadd.f32 %v517_v9, %v403_v3 }
  0xde   : > { %879 = vperm.xlu1 %1432, %v1843_v58   ;;  %v407_v58 = vmul.f32 %v1806_v6, %v1850_v14  ;;  %v552_v14 = vadd.f32 %v520_v22, %v406_v25 }
  0xdf   : > { %v602_v5 = vpop.permute.xlu1 %601  ;;  %v748_v16 = vpop.permute.xlu0 %747 }
  0xe0   : > { %v665_v40 = vmul.f32 %v1810_v8, %v602_v5  ;;  %v664_v31 = vmul.f32 %v1808_v7, %v602_v5  ;;  %v553_v47 = vadd.f32 %v521_v27, %v407_v58  ;;  %v698_v49 = vadd.f32 %v666_v28, %v552_v14 }
  0xe2   : > { %871 = vperm.xlu1 %1432, %v1723_v29   ;;  %v697_v12 = vadd.f32 %v665_v40, %v551_v33  ;;  %v699_v34 = vadd.f32 %v667_v37, %v553_v47 }
  0xe4   : > { %v325_v23 = vpop.permute.xlu1 %324  ;;  %v809_v51 = vadd.f32 %v758_v39, %v697_v12 }
  0xe5   : > { %v401_v59 = vmul.f32 %v1806_v6, %v325_v23  ;;  %v400_v60 = vmul.f32 %v1804_v4, %v325_v23 }
  0xe6   : > { %863 = vperm.xlu1 %1432, %v1730_v30   ;;  %v550_v30 = vadd.f32 %v518_v19, %v404_v20  ;;  %v841_v53 = vmax.f32 %v809_v51, 0.0 }
  0xe7   : > { %v547_v15 = vadd.f32 %v515_v57, %v401_v59 }
  0xe8   : > { %v696_v11 = vadd.f32 %v664_v31, %v550_v30 }
  0xe9   : > { %v598_v42 = vpop.permute.xlu1 %597 }
  0xea   : > { %1435 = vset.pattern.permute.xlu1 %v1504_v2  ;;  %v808_v52 = vadd.f32 %v758_v39, %v696_v11  ;;  %v663_v17 = vmul.f32 %v1810_v8, %v598_v42  ;;  %v511_v39 = vmul.f32 %v1801_v1, %v1779_v46  ;;  %v398_v11 = vmul.f32 %v1804_v4, %v1899_v21 }
  0xeb   : > { %1036 = vperm.xlu1 %1435, %v1723_v29  }
  0xec   : > { %v840_v54 = vmax.f32 %v808_v52, 0.0  ;;  %v695_v20 = vadd.f32 %v663_v17, %v549_v18  ;;  %v300_v52 = vpop.permute.xlu0 %299 }
  0xee   : > { %v763_v50 = vpop.permute.xlu1 %762 }
  0xef   : > { %v810_v26 = vadd.f32 %v763_v50, %v698_v49  ;;  %v811_v45 = vadd.f32 %v763_v50, %v699_v34  ;;  %1032 = vperm.xlu1 %1435, %v1745_v32   ;;  %v514_v32 = vmul.f32 %v1799_v0, %v1774_v43  ;;  %v662_v43 = vmul.f32 %v1808_v7, %v598_v42 }
  0xf0   : > { %v399_v34 = vmul.f32 %v1806_v6, %v1899_v21 }
  0xf1   : > { %v842_v38 = vmax.f32 %v810_v26, 0.0  ;;  %v843_v13 = vmax.f32 %v811_v45, 0.0  ;;  %v546_v23 = vadd.f32 %v514_v32, %v400_v60  ;;  %v694_v25 = vadd.f32 %v662_v43, %v548_v35  ;;  %v738_v60 = vpop.permute.xlu0 %737 }
  0xf2   : > { %v510_v45 = vmul.f32 %v1799_v0, %v1779_v46 }
  0xf3   : > { %v444_v2 = vpop.permute.xlu1 %443  ;;  %904 = vmatprep.subr.mxu0 %v843_v13 }
  0xf4   : > { %905 = vmatpush1.msra.mxu0 %v842_v38  ;;  %v512_v50 = vmul.f32 %v1799_v0, %v444_v2  ;;  %v513_v51 = vmul.f32 %v1801_v1, %v444_v2 }
  0xf5   : > { %906 = vmatprep.subr.mxu0 %v841_v53  ;;  %v290_v35 = vpop.permute.xlu0 %289 }
  0xf6   : > { %907 = vmatpush1.msra.mxu0 %v840_v54  ;;  %v544_v21 = vadd.f32 %v512_v50, %v398_v11  ;;  %v545_v57 = vadd.f32 %v513_v51, %v399_v34 }
  0xf8   : > { %v594_v29 = vpop.permute.xlu1 %593 }
  0xf9   : > { %v661_v41 = vmul.f32 %v1810_v8, %v594_v29  ;;  %v660_v10 = vmul.f32 %v1808_v7, %v594_v29 }
  0xfb   : > { %v693_v48 = vadd.f32 %v661_v41, %v547_v15  ;;  %v692_v19 = vadd.f32 %v660_v10, %v546_v23 }
  0xfd   : > { %v315_v56 = vpop.permute.xlu1 %314  ;;  %v805_v40 = vadd.f32 %v748_v16, %v693_v48  ;;  %v804_v31 = vadd.f32 %v748_v16, %v692_v19  ;;  %v507_v19 = vmul.f32 %v1801_v1, %v1793_v55 }
  0xfe   : > { %v397_v12 = vmul.f32 %v1806_v6, %v315_v56  ;;  %v396_v49 = vmul.f32 %v1804_v4, %v315_v56 }
  0xff   : > { %v837_v30 = vmax.f32 %v805_v40, 0.0  ;;  %v836_v42 = vmax.f32 %v804_v31, 0.0  ;;  %v506_v31 = vmul.f32 %v1799_v0, %v1793_v55 }
 0x100   : > { %v543_v13 = vadd.f32 %v511_v39, %v397_v12  ;;  %v542_v56 = vadd.f32 %v510_v45, %v396_v49  ;;  %v728_v12 = vpop.permute.xlu0 %727 }
 0x102   : > { %v590_v5 = vpop.permute.xlu1 %589 }
 0x103   : > { %v658_v53 = vmul.f32 %v1808_v7, %v590_v5  ;;  %v659_v54 = vmul.f32 %v1810_v8, %v590_v5 }
 0x105   : > { %v690_v2 = vadd.f32 %v658_v53, %v544_v21  ;;  %v691_v24 = vadd.f32 %v659_v54, %v545_v57  ;;  %v723_v57 = vpop.permute.xlu0 %722 }
 0x107   : > { %v753_v58 = vpop.permute.xlu1 %752 }
 0x108   : > { %v806_v22 = vadd.f32 %v753_v58, %v694_v25  ;;  %v807_v27 = vadd.f32 %v753_v58, %v695_v20  ;;  %v394_v25 = vmul.f32 %v1804_v4, %v1928_v36  ;;  %v395_v20 = vmul.f32 %v1806_v6, %v1928_v36 }
 0x10a   : > { %v838_v33 = vmax.f32 %v806_v22, 0.0  ;;  %v839_v28 = vmax.f32 %v807_v27, 0.0 }
 0x10c   : > { %v436_v37 = vpop.permute.xlu1 %435  ;;  %908 = vmatprep.subr.mxu0 %v839_v28 }
 0x10d   : > { %909 = vmatpush1.msra.mxu0 %v838_v33  ;;  %v508_v58 = vmul.f32 %v1799_v0, %v436_v37  ;;  %v509_v22 = vmul.f32 %v1801_v1, %v436_v37  ;;  %v390_v37 = vmul.f32 %v1804_v4, %v300_v52 }
 0x10e   : > { %910 = vmatprep.subr.mxu0 %v837_v30  ;;  %v391_v30 = vmul.f32 %v1806_v6, %v300_v52 }
 0x10f   : > { %911 = vmatpush1.msra.mxu0 %v836_v42  ;;  %v540_v49 = vadd.f32 %v508_v58, %v394_v25  ;;  %v541_v34 = vadd.f32 %v509_v22, %v395_v20  ;;  %v503_v25 = vmul.f32 %v1801_v1, %v1796_v62 }
 0x111   : > { %v586_v14 = vpop.permute.xlu1 %585 }
 0x112   : > { %v657_v26 = vmul.f32 %v1810_v8, %v586_v14  ;;  %v656_v38 = vmul.f32 %v1808_v7, %v586_v14 }
 0x114   : > { %v689_v59 = vadd.f32 %v657_v26, %v543_v13  ;;  %v688_v32 = vadd.f32 %v656_v38, %v542_v56 }
 0x116   : > { %v305_v47 = vpop.permute.xlu1 %304  ;;  %v801_v9 = vadd.f32 %v738_v60, %v689_v59  ;;  %v800_v41 = vadd.f32 %v738_v60, %v688_v32 }
 0x117   : > { %v393_v48 = vmul.f32 %v1806_v6, %v305_v47  ;;  %v392_v16 = vmul.f32 %v1804_v4, %v305_v47 }
 0x118   : > { %v833_v17 = vmax.f32 %v801_v9, 0.0  ;;  %v832_v5 = vmax.f32 %v800_v41, 0.0 }
 0x119   : > { %v539_v36 = vadd.f32 %v507_v19, %v393_v48  ;;  %v538_v39 = vadd.f32 %v506_v31, %v392_v16  ;;  %v387_v48 = vmul.f32 %v1806_v6, %v290_v35  ;;  %v502_v19 = vmul.f32 %v1799_v0, %v1796_v62 }
 0x11b   : > { %v582_v29 = vpop.permute.xlu1 %581 }
 0x11c   : > { %v654_v42 = vmul.f32 %v1808_v7, %v582_v29  ;;  %v655_v14 = vmul.f32 %v1810_v8, %v582_v29 }
 0x11e   : > { %v686_v13 = vadd.f32 %v654_v42, %v540_v49  ;;  %v687_v53 = vadd.f32 %v655_v14, %v541_v34  ;;  %v859_v49 = vld [vmem:[%s2075_s2 + $0x28] sm:$0xff]  ;;  %v860_v34 = vld [vmem:[%s2075_s2 + $0x30] sm:$0xff] }
 0x120   : > { %v743_v3 = vpop.permute.xlu1 %742 }
 0x121   : > { %v802_v63 = vadd.f32 %v743_v3, %v690_v2  ;;  %v803_v46 = vadd.f32 %v743_v3, %v691_v24 }
 0x123   : > { %v834_v10 = vmax.f32 %v802_v63, 0.0  ;;  %v835_v15 = vmax.f32 %v803_v46, 0.0 }
 0x125   : > { %v428_v43 = vpop.permute.xlu1 %427  ;;  %912 = vmatprep.subr.mxu0 %v835_v15 }
 0x126   : > { %913 = vmatpush1.msra.mxu0 %v834_v10  ;;  %v505_v27 = vmul.f32 %v1801_v1, %v428_v43  ;;  %v504_v33 = vmul.f32 %v1799_v0, %v428_v43 }
 0x127   : > { %914 = vmatprep.subr.mxu0 %v833_v17 }
 0x128   : > { %915 = vmatpush1.msra.mxu0 %v832_v5  ;;  %v537_v50 = vadd.f32 %v505_v27, %v391_v30  ;;  %v536_v26 = vadd.f32 %v504_v33, %v390_v37 }
 0x12a   : > { %v578_v23 = vpop.permute.xlu1 %577 }
 0x12b   : > { %v653_v40 = vmul.f32 %v1810_v8, %v578_v23  ;;  %v652_v28 = vmul.f32 %v1808_v7, %v578_v23  ;;  %v386_v23 = vmul.f32 %v1804_v4, %v290_v35 }
 0x12d   : > { %v685_v51 = vadd.f32 %v653_v40, %v539_v36  ;;  %v684_v45 = vadd.f32 %v652_v28, %v538_v39  ;;  %v713_v28 = vpop.permute.xlu0 %712  ;;  %v856_v39 = vld [vmem:[%s2075_s2 + $0x10] sm:$0xff] }
 0x12f   : > { %v295_v18 = vpop.permute.xlu1 %294  ;;  %v797_v52 = vadd.f32 %v728_v12, %v685_v51  ;;  %v796_v59 = vadd.f32 %v728_v12, %v684_v45  ;;  %v855_v12 = vld [vmem:[%s2075_s2 + $0x8] sm:$0xff] }
 0x130   : > { %v388_v17 = vmul.f32 %v1804_v4, %v295_v18  ;;  %v389_v5 = vmul.f32 %v1806_v6, %v295_v18 }
 0x131   : > { %v829_v63 = vmax.f32 %v797_v52, 0.0  ;;  %v828_v46 = vmax.f32 %v796_v59, 0.0 }
 0x132   : > { %v534_v4 = vadd.f32 %v502_v19, %v388_v17  ;;  %v535_v31 = vadd.f32 %v503_v25, %v389_v5 }
 0x134   : > { %v574_v47 = vpop.permute.xlu1 %573 }
 0x135   : > { %v650_v11 = vmul.f32 %v1808_v7, %v574_v47  ;;  %v651_v55 = vmul.f32 %v1810_v8, %v574_v47 }
 0x137   : > { %v683_v38 = vadd.f32 %v651_v55, %v537_v50  ;;  %v682_v54 = vadd.f32 %v650_v11, %v536_v26  ;;  %v857_v11 = vld [vmem:[%s2075_s2 + $0x18] sm:$0xff]  ;;  %v858_v55 = vld [vmem:[%s2075_s2 + $0x20] sm:$0xff] }
 0x138   : > { %v861_v50 = vld [vmem:[%s2075_s2 + $0x38] sm:$0xff] }
 0x139   : > { %v733_v29 = vpop.permute.xlu1 %732  ;;  %v795_v24 = vadd.f32 %v723_v57, %v683_v38  ;;  %v794_v60 = vadd.f32 %v723_v57, %v682_v54 }
 0x13a   : > { %v798_v56 = vadd.f32 %v733_v29, %v686_v13  ;;  %v799_v21 = vadd.f32 %v733_v29, %v687_v53 }
 0x13b   : > { %v827_v9 = vmax.f32 %v795_v24, 0.0  ;;  %v826_v41 = vmax.f32 %v794_v60, 0.0  ;;  %v888_v60 = vpop.permute.xlu0 %887 }
 0x13c   : > { %v830_v32 = vmax.f32 %v798_v56, 0.0  ;;  %v831_v2 = vmax.f32 %v799_v21, 0.0 }
 0x13e   : > { %v420_v3 = vpop.permute.xlu1 %419  ;;  %916 = vmatprep.subr.mxu0 %v831_v2 }
 0x13f   : > { %917 = vmatpush1.msra.mxu0 %v830_v32  ;;  %v500_v15 = vmul.f32 %v1799_v0, %v420_v3  ;;  %v501_v43 = vmul.f32 %v1801_v1, %v420_v3 }
 0x140   : > { %918 = vmatprep.subr.mxu0 %v829_v63 }
 0x141   : > { %919 = vmatpush1.msra.mxu0 %v828_v46  ;;  %v532_v22 = vadd.f32 %v500_v15, %v386_v23  ;;  %v533_v27 = vadd.f32 %v501_v43, %v387_v48  ;;  %v876_v43 = vpop.permute.xlu0 %875 }
 0x142   : > { %920 = vmatprep.subr.mxu0 %v827_v9 }
 0x143   : > { %v570_v10 = vpop.permute.xlu1 %569  ;;  %921 = vmatpush1.msra.mxu0 %v826_v41 }
 0x144   : > { %v648_v20 = vmul.f32 %v1808_v7, %v570_v10  ;;  %v649_v16 = vmul.f32 %v1810_v8, %v570_v10 }
 0x146   : > { %v680_v33 = vadd.f32 %v648_v20, %v534_v4  ;;  %v681_v0 = vadd.f32 %v649_v16, %v535_v31  ;;  %v868_v4 = vpop.permute.xlu0 %867 }
 0x147   : > { %v566_v58 = vpop.permute.xlu1 %565 }
 0x148   : > { %v646_v40 = vmul.f32 %v1808_v7, %v566_v58  ;;  %v647_v18 = vmul.f32 %v1810_v8, %v566_v58  ;;  %v854_v8 = vld [vmem:[%s2075_s2] sm:$0xff] }
 0x14a   : > { %v678_v6 = vadd.f32 %v646_v40, %v532_v22  ;;  %v679_v35 = vadd.f32 %v647_v18, %v533_v27 }
 0x14c   : > { %v718_v30 = vpop.permute.xlu1 %717  ;;  %v791_v36 = vadd.f32 %v713_v28, %v679_v35  ;;  %v790_v42 = vadd.f32 %v713_v28, %v678_v6 }
 0x14d   : > { %v792_v62 = vadd.f32 %v718_v30, %v680_v33  ;;  %v793_v1 = vadd.f32 %v718_v30, %v681_v0 }
 0x14e   : > { %v823_v37 = vmax.f32 %v791_v36, 0.0  ;;  %v822_v7 = vmax.f32 %v790_v42, 0.0 }
 0x14f   : > { %v824_v14 = vmax.f32 %v792_v62, 0.0  ;;  %v825_v47 = vmax.f32 %v793_v1, 0.0 }
 0x151   : > { %922 = vmatprep.subr.mxu0 %v825_v47  ;;  %v892_v21 = vpop.permute.xlu1 %891 }
 0x152   : > { %923 = vmatpush1.msra.mxu0 %v824_v14 }
 0x153   : > { %924 = vmatprep.subr.mxu0 %v823_v37 }
 0x154   : > { %925 = vmatpush1.msra.mxu0 %v822_v7 }
 0x155   : > { %959 = vmatmul.mubr.f32.vlgmr.msra.gmra.mxu0 %v854_v8  ;;  %v884_v32 = vpop.permute.xlu1 %883 }
 0x156   : > { %964 = vmatprep.mubr.f32.mxu0 %v1507_v61 }
 0x159   : > { %965 = vmatmul.mubr.f32.gmra.mxu0 %v855_v12  ;;  %v880_v63 = vpop.permute.xlu1 %879 }
 0x15a   : > { %970 = vmatprep.mubr.f32.mxu0 %v1507_v61 }
 0x15d   : > { %971 = vmatmul.mubr.f32.gmra.mxu0 %v856_v39  ;;  %v872_v19 = vpop.permute.xlu1 %871  ;;  %v1023_v39 = vld [vmem:[%s2076_s3] sm:$0xff] }
 0x15e   : > { %976 = vmatprep.mubr.f32.mxu0 %v1507_v61 }
 0x161   : > { %977 = vmatmul.mubr.f32.gmra.mxu0 %v857_v11  ;;  %v864_v0 = vpop.permute.xlu1 %863  ;;  %v1024_v11 = vld [vmem:[%s2076_s3 + $0x8] sm:$0xff] }
 0x162   : > { %982 = vmatprep.mubr.f32.mxu0 %v1507_v61 }
 0x165   : > { %983 = vmatmul.mubr.f32.gmra.mxu0 %v858_v55  ;;  %v1025_v55 = vld [vmem:[%s2076_s3 + $0x10] sm:$0xff] }
 0x166   : > { %988 = vmatprep.mubr.f32.mxu0 %v1507_v61 }
 0x169   : > { %989 = vmatmul.mubr.f32.gmra.mxu0 %v859_v49  ;;  %v1026_v49 = vld [vmem:[%s2076_s3 + $0x18] sm:$0xff] }
 0x16a   : > { %994 = vmatprep.mubr.f32.mxu0 %v1507_v61 }
 0x16d   : > { %995 = vmatmul.mubr.f32.gmra.mxu0 %v860_v34  ;;  %v286_v34 = vld [vmem:[%s2078_s5] sm:$0x3] }
 0x16e   : > { %1000 = vmatprep.mubr.f32.mxu0 %v1507_v61 }
 0x171   : > { %1001 = vmatmul.mubr.f32.gmra.mxu0 %v861_v50  ;;  %v1508_v50 = vmov 3  }
 0x172   : > { %1436 = vset.pattern.permute.xlu1 %v1508_v50  ;;  %1437 = vset.pattern.permute.xlu0 %v1508_v50 }
 0x173   : > { %1156 = vperm.xlu1 %1436, %v286_v34  }
 0x215   : > { %v960_v51 = vpop.f32.mrf.mxu0 }
 0x216   : > { %v961_v14 = vadd.f32 %v960_v51, %v864_v0 }
 0x217   : > { %v962_v26 = vpop.f32.mrf.mxu0 }
 0x218   : > { %v963_v36 = vadd.f32 %v962_v26, %v864_v0  ;;  %v1007_v12 = vmax.f32 %v961_v14, 0.0 }
 0x219   : > { %v966_v45 = vpop.f32.mrf.mxu0 }
 0x21a   : > { %v967_v62 = vadd.f32 %v966_v45, %v868_v4  ;;  %v1008_v8 = vmax.f32 %v963_v36, 0.0 }
 0x21b   : > { %v968_v38 = vpop.f32.mrf.mxu0 }
 0x21c   : > { %v969_v28 = vadd.f32 %v968_v38, %v868_v4  ;;  %v1009_v7 = vmax.f32 %v967_v62, 0.0 }
 0x21d   : > { %v972_v13 = vpop.f32.mrf.mxu0 }
 0x21e   : > { %v973_v35 = vadd.f32 %v972_v13, %v872_v19  ;;  %v1010_v37 = vmax.f32 %v969_v28, 0.0 }
 0x21f   : > { %v974_v53 = vpop.f32.mrf.mxu0 }
 0x220   : > { %v975_v31 = vadd.f32 %v974_v53, %v872_v19  ;;  %v1011_v47 = vmax.f32 %v973_v35, 0.0  ;;  %v1037_v53 = vpop.permute.xlu1 %1036 }
 0x221   : > { %v978_v54 = vpop.f32.mrf.mxu0 }
 0x222   : > { %v979_v40 = vadd.f32 %v978_v54, %v876_v43  ;;  %v1012_v42 = vmax.f32 %v975_v31, 0.0 }
 0x223   : > { %v980_v29 = vpop.f32.mrf.mxu0 }
 0x224   : > { %v981_v22 = vadd.f32 %v980_v29, %v876_v43  ;;  %v1013_v1 = vmax.f32 %v979_v40, 0.0  ;;  %v1041_v29 = vpop.permute.xlu0 %1040 }
 0x225   : > { %v984_v56 = vpop.f32.mrf.mxu0 }
 0x226   : > { %v985_v16 = vadd.f32 %v984_v56, %v880_v63  ;;  %v1014_v30 = vmax.f32 %v981_v22, 0.0 }
 0x227   : > { %v986_v52 = vpop.f32.mrf.mxu0 }
 0x228   : > { %v987_v25 = vadd.f32 %v986_v52, %v880_v63  ;;  %v1015_v33 = vmax.f32 %v985_v16, 0.0 }
 0x229   : > { %v990_v57 = vpop.f32.mrf.mxu0 }
 0x22a   : > { %v991_v23 = vadd.f32 %v990_v57, %v884_v32  ;;  %v1016_v6 = vmax.f32 %v987_v25, 0.0 }
 0x22b   : > { %v992_v59 = vpop.f32.mrf.mxu0 }
 0x22c   : > { %v993_v17 = vadd.f32 %v992_v59, %v884_v32  ;;  %v1017_v18 = vmax.f32 %v991_v23, 0.0  ;;  %v1153_v23 = vld [vmem:[%s2077_s4] sm:$0x3] }
 0x22d   : > { %v996_v2 = vpop.f32.mrf.mxu0 }
 0x22e   : > { %v997_v15 = vadd.f32 %v996_v2, %v888_v60  ;;  %v1018_v27 = vmax.f32 %v993_v17, 0.0  ;;  %v1029_v2 = vpop.permute.xlu0 %1028 }
 0x22f   : > { %v998_v24 = vpop.f32.mrf.mxu0 }
 0x230   : > { %v999_v41 = vadd.f32 %v998_v24, %v888_v60  ;;  %v1019_v58 = vmax.f32 %v997_v15, 0.0 }
 0x231   : > { %v1002_v3 = vpop.f32.mrf.mxu0 }
 0x232   : > { %v1003_v46 = vadd.f32 %v1002_v3, %v892_v21  ;;  %v1020_v20 = vmax.f32 %v999_v41, 0.0 }
 0x233   : > { %v1004_v9 = vpop.f32.mrf.mxu0 }
 0x234   : > { %v1005_v10 = vadd.f32 %v1004_v9, %v892_v21  ;;  %v1021_v48 = vmax.f32 %v1003_v46, 0.0 }
 0x236   : > { %v1022_v5 = vmax.f32 %v1005_v10, 0.0 }
 0x238   : > { %1072 = vmatprep.subr.mxu1 %v1022_v5 }
 0x239   : > { %1073 = vmatpush1.msra.mxu1 %v1021_v48 }
 0x23a   : > { %1074 = vmatprep.subr.mxu1 %v1020_v20 }
 0x23b   : > { %1075 = vmatpush1.msra.mxu1 %v1019_v58 }
 0x23c   : > { %1076 = vmatprep.subr.mxu1 %v1018_v27 }
 0x23d   : > { %1077 = vmatpush1.msra.mxu1 %v1017_v18 }
 0x23e   : > { %1078 = vmatprep.subr.mxu1 %v1016_v6 }
 0x23f   : > { %1079 = vmatpush1.msra.mxu1 %v1015_v33 }
 0x240   : > { %1080 = vmatprep.subr.mxu1 %v1014_v30 }
 0x241   : > { %1081 = vmatpush1.msra.mxu1 %v1013_v1 }
 0x242   : > { %1082 = vmatprep.subr.mxu1 %v1012_v42 }
 0x243   : > { %1083 = vmatpush1.msra.mxu1 %v1011_v47 }
 0x244   : > { %1084 = vmatprep.subr.mxu1 %v1010_v37 }
 0x245   : > { %1085 = vmatpush1.msra.mxu1 %v1009_v7 }
 0x246   : > { %1086 = vmatprep.subr.mxu1 %v1008_v8 }
 0x247   : > { %1087 = vmatpush1.msra.mxu1 %v1007_v12 }
 0x248   : > { %1336 = vmatmul.mubr.msk.f32.vlgmr.msra.gmra.mxu1 %vm1043_vm0, %v1023_v39 }
 0x249   : > { %1126 = vmatprep.mubr.f32.mxu1 %v1507_v61 }
 0x24c   : > { %1337 = vmatmul.mubr.msk.f32.gmra.mxu1 %vm1043_vm0, %v1024_v11 }
 0x24d   : > { %1132 = vmatprep.mubr.f32.mxu1 %v1507_v61 }
 0x250   : > { %1338 = vmatmul.mubr.msk.f32.gmra.mxu1 %vm1043_vm0, %v1025_v55 }
 0x251   : > { %1138 = vmatprep.mubr.f32.mxu1 %v1507_v61 }
 0x254   : > { %1339 = vmatmul.mubr.msk.f32.gmra.mxu1 %vm1043_vm0, %v1026_v49 }
 0x255   : > { %1227 = vmatprep.mubr.f32.mxu1 %v1507_v61  ;;  %v1033_v61 = vpop.permute.xlu1 %1032 }
 0x259   : > { %v1157_v48 = vpop.permute.xlu1 %1156 }
 0x308   : > { %v1122_v51 = vpop.f32.mrf.mxu1 }
 0x309   : > { %v1123_v41 = vadd.f32 %v1122_v51, %v1029_v2 }
 0x30a   : > { %v1124_v26 = vpop.f32.mrf.mxu1 }
 0x30b   : > { %v1125_v46 = vadd.f32 %v1124_v26, %v1029_v2  ;;  %v1145_v5 = vmax.f32 %v1123_v41, 0.0 }
 0x30c   : > { %v1128_v45 = vpop.f32.mrf.mxu1 }
 0x30d   : > { %v1129_v3 = vadd.f32 %v1128_v45, %v1033_v61  ;;  %v1146_v17 = vmax.f32 %v1125_v46, 0.0 }
 0x30e   : > { %v1130_v38 = vpop.f32.mrf.mxu1 }
 0x30f   : > { %v1131_v24 = vadd.f32 %v1130_v38, %v1033_v61  ;;  %v1147_v43 = vmax.f32 %v1129_v3, 0.0 }
 0x310   : > { %v1134_v13 = vpop.f32.mrf.mxu1 }
 0x311   : > { %v1135_v32 = vadd.f32 %v1134_v13, %v1037_v53  ;;  %v1148_v15 = vmax.f32 %v1131_v24, 0.0 }
 0x312   : > { %v1136_v54 = vpop.f32.mrf.mxu1 }
 0x313   : > { %v1137_v57 = vadd.f32 %v1136_v54, %v1037_v53  ;;  %v1149_v10 = vmax.f32 %v1135_v32, 0.0 }
 0x314   : > { %v1140_v56 = vpop.f32.mrf.mxu1 }
 0x315   : > { %v1141_v21 = vadd.f32 %v1140_v56, %v1041_v29  ;;  %v1150_v9 = vmax.f32 %v1137_v57, 0.0 }
 0x316   : > { %v1142_v52 = vpop.f32.mrf.mxu1 }
 0x317   : > { %v1143_v59 = vadd.f32 %v1142_v52, %v1041_v29  ;;  %v1151_v63 = vmax.f32 %v1141_v21, 0.0 }
 0x319   : > { %v1152_v60 = vmax.f32 %v1143_v59, 0.0 }
 0x31b   : > { %1187 = vmatprep.subr.mxu1 %v1152_v60 }
 0x31c   : > { %1188 = vmatpush1.msra.mxu1 %v1151_v63 }
 0x31d   : > { %1189 = vmatprep.subr.mxu1 %v1150_v9 }
 0x31e   : > { %1190 = vmatpush1.msra.mxu1 %v1149_v10 }
 0x31f   : > { %1191 = vmatprep.subr.mxu1 %v1148_v15 }
 0x320   : > { %1192 = vmatpush1.msra.mxu1 %v1147_v43 }
 0x321   : > { %1193 = vmatprep.subr.mxu1 %v1146_v17 }
 0x322   : > { %1194 = vmatpush1.msra.mxu1 %v1145_v5 }
 0x323   : > { %1340 = vmatmul.mubr.msk.f32.vlgmr.msra.gmra.mxu1 %vm1159_vm1, %v1153_v23 }
 0x3e3   : > { %v1229_v19 = vpop.f32.mrf.mxu1 }
 0x3e4   : > { %v1230_v25 = vadd.f32 %v1229_v19, %v1157_v48 }
 0x3e5   : > { %v1231_v20 = vpop.f32.mrf.mxu1 }
 0x3e6   : > { %v1237_v16 = vmul.f32 1.442695, %v1230_v25  ;;  %v1232_v58 = vadd.f32 %v1231_v20, %v1157_v48 }
 0x3e8   : > { %1438 = vpow2.f32 %v1237_v16  ;;  %v1239_v22 = vmul.f32 1.442695, %v1232_v58 }
 0x3ea   : > { %1440 = vpow2.f32 %v1239_v22 }
 0x3f5   : > { %v1439_v27 = vpop.eup %1438 }
 0x3f6   : > { %v1241_v18 = vsel %vm1236_vm2, %v1230_v25, %v1439_v27 }
 0x3f7   : > { %v1441_v40 = vpop.eup %1440 }
 0x3f8   : > { %v1242_v4 = vsel %vm1236_vm2, %v1232_v58, %v1441_v40 }
 0x3f9   : > { %v1245_v31 = vcombine.low %v1241_v18, %v1242_v4 }
 0x3fb   : > { %1341 = vst.sshfl [vmem:[%s245_s19] sm:$0x33 pattern:$0x76325410] %v1245_v31 }
 0x3fc   : > { %1455 = shalt.err (!%p1452_p3)
}
 0x3fd   : > { %s1456_s13 = scalar_lea.hbm %s1268_s29, 64  ;;  %s1460_s16 = scalar_lea.hbm %s2079_s6, 128 }
 0x3fe   : > { %p1457_p4 = scmp.ne.s32.totalorder %s1268_s29, %s1456_s13  ;;  %p1461_p9 = scmp.lt.s32.totalorder %s1268_s29, %s2079_s6 }
 0x3ff   : > { %p1462_p10 = scmp.lt.s32.totalorder %s1460_s16, %s1456_s13 }
 0x400   : > { %p1458_p7 = pnand %p1457_p4, %p1583_p5 }
 0x401   : > { %p1463_p11 = por %p1462_p10, %p1461_p9 }
 0x402   : > { %p1459_p8 = pneg %p1458_p7 }
 0x404   : > { %p1464_p12 = pnand %p1463_p11, %p1459_p8 }
 0x406   : > { %1467 = shalt.err (!%p1464_p12)
}
 0x407   : > { %1348 = dma.vmem_to_hbm [thread:$0]  (%p1583_p5), %s1271_s20, 64, %s1268_s29, %s1256_s9  }
 0x408 PF: > { %p1354_p13 = scmp.ge.s32.totalorder %s1502_s24, 2  ;;  %s1282_s19 = sand.u32 1, %s1490_s21  }
 0x409   : > { %s1283_s26 = scalar_lea.sflag [#allocation3], %s1282_s19 }
 0x40a   : > { %p1351_p0 = pnand %p1354_p13, %p1587_p6 }
 0x40c   : > { %p1352_p1 = pneg %p1351_p0 }
 0x40e   : > { %1485 = dma.done.wait (%p1352_p1), %s1283_s26, 64  }
 0x40f   : > { %1487 = vsyncadd (%p1352_p1), %s1283_s26, 4294967232  ;;  %p16_p2 = scmp.ge.s32.totalorder %s1570_s27, 4   ;;  %s2082_s21 = smov %s1494_s22 }
 0x410   : > { %s2083_s22 = smov %s1498_s23  ;;  %s2084_s23 = smov %s1581_s30 }
 0x411   : > { %s2085_s24 = smov %s1570_s27  ;;  %18 = sbr.rel (!%p16_p2) target bundleno = 3 (0x3), region = 79 }
 0x416   :  { %1288 = vsyncpa [#allocation3], 1 }
 0x417   :  { %1290 = vsyncpa [#allocation3 + $0x1], 1 }

</bundles_post_ra>
